<compile_context>
chip_gen: v7x
topology: tpu7x:2x2x1
jax: 0.10.0
libtpu: 0.0.40
codegen_flags: <defaults>
</compile_context>

<pallas_src>
import jax
import jax.numpy as jnp
from jax.experimental import pallas as pl
from jax.experimental.pallas import tpu as pltpu


def _sigmoid_kernel(x_ref, o_ref):
    # sigmoid(x) = 0.5 * tanh(0.5 * x) + 0.5   (EUP tanh + one VALU FMA).
    # Compute in f32: exact within f32 rounding, and v5e's VPU/EUP has no bf16
    # path, so the upcast keeps this portable across v5e/v6e/v7x.
    xf = x_ref[...].astype(jnp.float32)
    o_ref[...] = (0.5 * jnp.tanh(0.5 * xf) + 0.5).astype(o_ref.dtype)


def pallas_sigmoid(x: jax.Array, *, target_block_bytes: int = 8 * 1024 * 1024) -> jax.Array:
    """Elementwise sigmoid over an arbitrarily-shaped array via a Pallas kernel."""
    orig_shape = x.shape
    dtype = x.dtype
    n = x.size
    if n == 0:
        return x

    itemsize = jnp.dtype(dtype).itemsize
    LANE = 128
    # Fixed lane width: wide when it divides evenly (slightly wider stores),
    # otherwise 128 (still unmasked vst).  No divisor search.
    lane_width = 512 if n % 512 == 0 else LANE

    x_flat = x.reshape(-1)
    n_main = (n // lane_width) * lane_width

    if n_main == 0:
        # Whole array is smaller than one lane row — not worth a kernel launch.
        return jax.nn.sigmoid(x).astype(dtype)

    rows = n_main // lane_width
    row_bytes = lane_width * itemsize
    # Sub-32-bit dtypes pack along sublanes: round block rows to the packed
    # sublane multiple (8 f32 / 16 bf16 / 32 int8) to keep stores unmasked.
    sublane = max(8, 32 // itemsize)

    # Rows per block from the ~8 MiB byte budget, rounded to a sublane multiple.
    tile_rows = max(sublane, (target_block_bytes // row_bytes) // sublane * sublane)
    steps = pl.cdiv(rows, tile_rows)
    # v7x: at least 4 (and an even number of) grid steps whenever there is
    # enough work, so both TensorCores get blocks and DMA/compute overlap.
    if rows >= 4 * sublane:
        steps = max(steps, 4)
    if steps > 1 and steps % 2:
        steps += 1

    if steps == 1:
        tile_rows = rows  # full-extent block is always a legal block shape
    else:
        tile_rows = pl.cdiv(pl.cdiv(rows, steps), sublane) * sublane
    grid = (pl.cdiv(rows, tile_rows),)

    x_main = x_flat if n_main == n else x_flat[:n_main]
    x2d = x_main.reshape(rows, lane_width)

    out2d = pl.pallas_call(
        _sigmoid_kernel,
        out_shape=jax.ShapeDtypeStruct((rows, lane_width), dtype),
        grid_spec=pltpu.PrefetchScalarGridSpec(
            num_scalar_prefetch=0,
            grid=grid,
            in_specs=[pl.BlockSpec((tile_rows, lane_width), lambda i: (i, 0))],
            out_specs=pl.BlockSpec((tile_rows, lane_width), lambda i: (i, 0)),
        ),
        compiler_params=pltpu.CompilerParams(
            dimension_semantics=("parallel",),
            # 2 (double buffer) * 2 (in + out) * ~8 MiB blocks = ~32 MiB plus
            # headroom: fits v7x's 64 MiB physical VMEM and overrides the
            # 16/32 MiB scoped defaults on v5e/v6e.
            vmem_limit_bytes=48 * 1024 * 1024,
        ),
    )(x2d)

    out_main = out2d.reshape(-1)
    if n_main == n:
        return out_main.reshape(orig_shape)

    # < lane_width leftover elements: plain JAX on the tiny tail, one stitch.
    # TODO(synk): a fully zero-copy stitch would need the ragged tail handled
    # inside the kernel (manual DMA); not worth it for < 512 elements.
    tail = jax.nn.sigmoid(x_flat[n_main:]).astype(dtype)
    return jnp.concatenate([out_main, tail]).reshape(orig_shape)


if __name__ == "__main__":
    key = jax.random.PRNGKey(0)
    x = jax.random.normal(key, (2, 4, 16, 16), dtype=jnp.float32)

    y = pallas_sigmoid(x)
    jax.block_until_ready(y)

    y_ref = jax.nn.sigmoid(x)
    assert y.shape == x.shape and y.dtype == x.dtype
    assert jnp.allclose(y, y_ref, atol=1e-6, rtol=1e-6)

    # Also exercise the unaligned (tail) path: 7*300 = 2100 elements, not a
    # multiple of 128.
    x2 = jax.random.normal(jax.random.PRNGKey(1), (7, 300), dtype=jnp.float32)
    y2 = pallas_sigmoid(x2)
    jax.block_until_ready(y2)
    assert y2.shape == x2.shape and y2.dtype == x2.dtype
    assert jnp.allclose(y2, jax.nn.sigmoid(x2), atol=1e-6, rtol=1e-6)

    print("KERNEL_OK")
</pallas_src>

<mosaic_0001>
module attributes {stable_mosaic.version = 11 : i64} {
  func.func @_sigmoid_kernel(%arg0: i32, %arg1: memref<4x512xf32, #tpu.memory_space<vmem>>, %arg2: memref<4x512xf32, #tpu.memory_space<vmem>>) attributes {dimension_semantics = [#tpu.dimension_semantics<parallel>], iteration_bounds = array<i64: 1>, scalar_prefetch = 0 : i64, scratch_operands = 0 : i64, tpu.core_type = #tpu.core_type<tc>, window_params = [{transform_indices = @transform_0, window_bounds = array<i64: 4, 512>}, {transform_indices = @transform_1, window_bounds = array<i64: 4, 512>}]} {
    %c0 = arith.constant 0 : index
    %c0_0 = arith.constant 0 : index
    %0 = vector.load %arg1[%c0, %c0_0] : memref<4x512xf32, #tpu.memory_space<vmem>>, vector<4x512xf32>
    %cst = arith.constant 5.000000e-01 : f32
    %1 = vector.broadcast %cst : f32 to vector<4x512xf32>
    %2 = arith.mulf %1, %0 : vector<4x512xf32>
    %3 = math.tanh %2 : vector<4x512xf32>
    %cst_1 = arith.constant 5.000000e-01 : f32
    %4 = vector.broadcast %cst_1 : f32 to vector<4x512xf32>
    %5 = arith.mulf %4, %3 : vector<4x512xf32>
    %cst_2 = arith.constant 5.000000e-01 : f32
    %6 = vector.broadcast %cst_2 : f32 to vector<4x512xf32>
    %7 = arith.addf %5, %6 : vector<4x512xf32>
    %c0_3 = arith.constant 0 : index
    %c0_4 = arith.constant 0 : index
    %8 = vector.load %arg2[%c0_3, %c0_4] : memref<4x512xf32, #tpu.memory_space<vmem>>, vector<4x512xf32>
    tpu.vector_store %arg2[%c0_3, %c0_4], %7 {strides = array<i32>} : memref<4x512xf32, #tpu.memory_space<vmem>>, vector<4x512xf32>,
    return
  }
  func.func @transform_0(%arg0: i32) -> (i32, i32) {
    %c0_i32 = arith.constant 0 : i32
    %c0_i32_0 = arith.constant 0 : i32
    return %arg0, %c0_i32 : i32, i32
  }
  func.func @transform_1(%arg0: i32) -> (i32, i32) {
    %c0_i32 = arith.constant 0 : i32
    %c0_i32_0 = arith.constant 0 : i32
    return %arg0, %c0_i32 : i32, i32
  }
}

</mosaic_0001>

<bundles_post_ra>
// kernel: tpu_custom_call.1
= control target key start
LH: loop header
LB: loop body
LE: loop exit
PB: predicated region body
PF: predicated region fallthrough
CT: control target
= control target key end

     0   :  { %6 = vsyncpa [#allocation3], 0  ;;  %s138_s0 = inlined_call_operand.hbm [shape: f32[4,512], index: 0, kind: input, shape index: {}]   ;;  %s139_s1 = inlined_call_operand.hbm [shape: f32[4,512], index: 1, kind: output, shape index: {}]  }
   0x1   :  { %7 = vsyncpa [#allocation4], 0  ;;  %s102_s6 = smov [#allocation2]   ;;  %s54_s10 = scalar_lea.hbm %s138_s0, 256 }
   0x2   :  { %s14_s7 = sshll.u32 %s102_s6, 4  ;;  %p55_p0 = scmp.ne.s32.totalorder %s138_s0, %s54_s10  ;;  %s15_s7 = int_to_ptr.vmem [resolvable:$true] %s14_s7 }
   0x3   :  { %p58_p1 = scmp.lt.u32.totalorder %s54_s10, %s138_s0 }
   0x5   :  { %p60_p2 = pnand %p58_p1, %p55_p0 }
   0x7   :  { %63 = shalt.err (!%p60_p2)
}
   0x8   :  { %s64_s15 = scalar_lea.vmem %s15_s7, 256  ;;  %p69_p4 = scmp.lt.s32.totalorder %s15_s7, %s15_s7 }
   0x9   :  { %p65_p3 = scmp.ne.s32.totalorder %s15_s7, %s64_s15  ;;  %p70_p5 = scmp.lt.s32.totalorder %s64_s15, %s64_s15 }
   0xb   :  { %p71_p6 = por %p70_p5, %p69_p4 }
   0xd   :  { %p72_p7 = pnand %p71_p6, %p65_p3 }
   0xf   :  { %75 = shalt.err (!%p72_p7)
}
  0x10   :  { %17 = dma.hbm_to_vmem [thread:$0]  %s138_s0, 256, %s15_s7, [#allocation3]  }
  0x11   :  { %98 = dma.done.wait [#allocation3], 256  }
  0x12   :  { %99 = vsyncadd [#allocation3], 4294967040  ;;  %v21_v0 = vld [vmem:[#allocation2] sm:$0xff]  ;;  %v22_v1 = vld [vmem:[#allocation2 + $0x8] sm:$0xff]  ;;  %s103_s18 = smov [#allocation5]  }
  0x13   :  { %v23_v2 = vmul.f32 0.5, %v21_v0  ;;  %v24_v3 = vmul.f32 0.5, %v22_v1  ;;  %s39_s19 = sshll.u32 %s103_s18, 4  ;;  %s40_s19 = int_to_ptr.vmem [resolvable:$true] %s39_s19 }
  0x14   :  { %s76_s0 = scalar_lea.vmem %s40_s19, 256  ;;  %p81_p9 = scmp.lt.s32.totalorder %s40_s19, %s40_s19 }
  0x15   :  { %50 = vtanh.f32 %v23_v2  ;;  %p77_p8 = scmp.ne.s32.totalorder %s40_s19, %s76_s0  ;;  %p82_p10 = scmp.lt.s32.totalorder %s76_s0, %s76_s0 }
  0x16   :  { %52 = vtanh.f32 %v24_v3 }
  0x17   :  { %p83_p11 = por %p82_p10, %p81_p9 }
  0x19   :  { %p84_p12 = pnand %p83_p11, %p77_p8 }
  0x1f   :  { %v51_v4 = vpop.eup %50 }
  0x20   :  { %v53_v5 = vpop.eup %52  ;;  %v27_v6 = vmul.f32 0.5, %v51_v4 }
  0x21   :  { %v28_v7 = vmul.f32 0.5, %v53_v5 }
  0x22   :  { %v29_v8 = vadd.f32 0.5, %v27_v6 }
  0x23   :  { %v30_v9 = vadd.f32 0.5, %v28_v7 }
  0x24   :  { %31 = vst [vmem:[#allocation5] sm:$0xff] %v29_v8 }
  0x25   :  { %32 = vst [vmem:[#allocation5 + $0x8] sm:$0xff] %v30_v9 }
  0x26   :  { %87 = shalt.err (!%p84_p12)
}
  0x27   :  { %s88_s22 = scalar_lea.hbm %s139_s1, 256 }
  0x28   :  { %p89_p13 = scmp.ne.s32.totalorder %s139_s1, %s88_s22  ;;  %p92_p0 = scmp.lt.u32.totalorder %s88_s22, %s139_s1 }
  0x2a   :  { %p94_p1 = pnand %p92_p0, %p89_p13 }
  0x2c   :  { %97 = shalt.err (!%p94_p1)
}
  0x2d   :  { %42 = dma.vmem_to_hbm [thread:$0]  %s40_s19, 256, %s139_s1, [#allocation4]  }
  0x2e   :  { %100 = dma.done.wait [#allocation4], 256  }
  0x2f   :  { %101 = vsyncadd [#allocation4], 4294967040 }
  0x30   :  { %46 = vsyncpa [#allocation3], 1 }
  0x31   :  { %47 = vsyncpa [#allocation4], 1 }

</bundles_post_ra>
